<compile_context>
chip_gen: v5e
topology: v5e:2x2
jax: 0.10.0
libtpu: 0.0.40
codegen_flags: <defaults>
</compile_context>

<pallas_src>
import numpy as np
import jax
import jax.numpy as jnp
from jax.experimental import pallas as pl
from jax.experimental.pallas import tpu as pltpu


def _round_up(a, m):
    return ((a + m - 1) // m) * m


# ----------------------------- Pallas kernel ------------------------------ #

def _arap_kernel(l_ref, g_ref, j_ref, jt_ref, mat_ref, acc_ref):
    """Per-(batch, k-tile) ARAP Hessian-bar accumulation.

    l_ref:   (TK, Mpad)      row-block of the shared Laplacian (bf16)
    g_ref:   (1, TK, Mpad)   row-block of G = blockdiag(Lc^{-1}) B^T (bf16)
    j_ref:   (1, Mpad, Dpad) full (padded) Jacobian, resident across k (bf16)
    jt_ref:  (1, Dpad, TK)   column-block of J^T (f32)
    mat_ref: (1, Dpad, Dpad) output   J^T L J - (G J)^T (G J)
    acc_ref: (Dpad, Dpad)    f32 accumulator scratch
    """
    kk = pl.program_id(1)

    @pl.when(kk == 0)
    def _():
        acc_ref[...] = jnp.zeros_like(acc_ref)

    f32 = jnp.float32
    Lk = l_ref[...]          # (TK, Mpad)  bf16
    Gk = g_ref[0]            # (TK, Mpad)  bf16
    Jm = j_ref[0]            # (Mpad, Dpad) bf16
    JTk = jt_ref[0]          # (Dpad, TK)  f32

    # Big MXU matmuls in bf16 with f32 accumulation.
    LJk = jnp.dot(Lk, Jm, preferred_element_type=f32)    # (TK, Dpad)
    GJk = jnp.dot(Gk, Jm, preferred_element_type=f32)    # (TK, Dpad)

    # J^T (L J): J^T was transposed once in the wrapper -> plain matmul.
    JTLJ = jnp.dot(JTk, LJk, preferred_element_type=f32)  # (Dpad, Dpad)

    # (G J)^T (G J): contract the shared row (3N-tile) axis of both operands.
    gram = jax.lax.dot_general(GJk, GJk, (((0,), (0,)), ((), ())),
                               preferred_element_type=f32)  # (Dpad, Dpad)

    acc_ref[...] += JTLJ - gram

    @pl.when(kk == pl.num_programs(1) - 1)
    def _():
        mat_ref[0] = acc_ref[...].astype(mat_ref.dtype)


# ------------------------------- ARAP module ------------------------------ #

class ARAP:
    def __init__(self, template_face, num_points, norm=0.5, c_reg=1e-8):
        N = num_points
        self.N = N
        self.norm = norm
        # small relative diagonal regularizer on the per-vertex 3x3 C blocks
        # (guards against singular blocks for degenerate / low-valence vertices)
        self.c_reg = c_reg

        # adjacency from triangle faces, symmetrized (matches torch __init__)
        adj = np.zeros((N, N))
        adj[template_face[:, 0], template_face[:, 1]] = 1
        adj[template_face[:, 1], template_face[:, 2]] = 1
        adj[template_face[:, 0], template_face[:, 2]] = 1
        adj = adj + adj.T
        e0, e1 = np.where(adj > 0)
        self.e0 = jnp.asarray(e0, jnp.int32)
        self.e1 = jnp.asarray(e1, jnp.int32)
        self.edge_weight = jnp.ones((e0.shape[0],), jnp.float32)

        # dense 2 * (D - A)  kron  I3   (== get_laplacian_kron3x3, unit weights)
        A = (adj > 0).astype(np.float32)
        deg = A.sum(1)
        Lsmall = 2.0 * (np.diag(deg) - A)
        self.L_dense = jnp.asarray(np.kron(Lsmall, np.eye(3)), jnp.float32)

    # --- glue (plain JAX): per-batch operators --------------------------- #

    def _build_B(self, x_b):
        """Dense B [3N,3N] from per-edge skew(edge_vec) blocks."""
        e0, e1, w = self.e0, self.e1, self.edge_weight
        ev = x_b[e0] - x_b[e1]                         # [E, 3]
        z = jnp.zeros_like(ev[:, 0])
        skew = jnp.stack([
            jnp.stack([z,         -ev[:, 2],  ev[:, 1]], -1),
            jnp.stack([ev[:, 2],   z,        -ev[:, 0]], -1),
            jnp.stack([-ev[:, 1],  ev[:, 0],  z       ], -1),
        ], axis=-2) * w[:, None, None]                 # [E, 3, 3]

        M3 = 3 * self.N
        d = jnp.arange(3)
        rows = e0[:, None, None] * 3 + d[None, :, None]     # [E,3,1]
        cols_b = e1[:, None, None] * 3 + d[None, None, :]   # [E,1,3]
        cols_a = e0[:, None, None] * 3 + d[None, None, :]   # [E,1,3]
        B = jnp.zeros((M3, M3), jnp.float32)
        B = B.at[rows, cols_b].add(skew)   # block (e0, e1) += skew(ev)
        B = B.at[rows, cols_a].add(skew)   # block (e0, e0) += skew(ev)
        return B

    def _build_C_blocks(self, x_b):
        """Per-vertex 3x3 blocks  C_n = sum_edges (|ev|^2 I - ev ev^T) w."""
        e0, e1, w = self.e0, self.e1, self.edge_weight
        ev = x_b[e0] - x_b[e1]                          # [E, 3]
        sq = (ev * ev).sum(-1)                          # [E]
        blocks = (sq[:, None, None] * jnp.eye(3, dtype=jnp.float32)
                  - ev[:, :, None] * ev[:, None, :]) * w[:, None, None]
        return jax.ops.segment_sum(blocks, e0, num_segments=self.N)  # [N,3,3]

    def _reg_C(self, C):
        tr = jnp.trace(C, axis1=-2, axis2=-1)
        eps = self.c_reg * tr / 3.0 + 1e-30
        return C + eps[:, None, None] * jnp.eye(3, dtype=jnp.float32)

    def _build_G(self, x_b):
        """G = blockdiag(Lc^{-1}) @ B^T  so that  B C^{-1} B^T = G^T G."""
        N, M3 = self.N, 3 * self.N
        Bm = self._build_B(x_b)                         # [3N, 3N]
        Creg = self._reg_C(self._build_C_blocks(x_b))   # [N, 3, 3]
        Lc = jnp.linalg.cholesky(Creg)                  # lower, [N,3,3]
        Lc_inv = jnp.linalg.inv(Lc)                     # tiny 3x3 inverses
        Bt3 = Bm.T.reshape(N, 3, M3)
        G3 = jnp.matmul(Lc_inv, Bt3)                    # [N, 3, 3N]
        return G3.reshape(M3, M3)

    # ------------------------------ forward ------------------------------ #

    def forward(self, x, J, k=0):
        """x: [B, N, 3] points,  J: [B, N*3, D] Jacobian.  Returns (mean trace, Hbars)."""
        Bsz, N, _ = x.shape
        M3 = 3 * N
        D = J.shape[-1]
        assert J.shape == (Bsz, M3, D)

        # --- padding / tiling choices ---
        Dpad = _round_up(D, 128)          # lane-dense output + full-width MXU RHS
        TK_CAP = 768                      # contraction row-tile cap (multiple of 128)
        if M3 <= TK_CAP:
            Mpad = _round_up(M3, 8)
            TK = Mpad
        else:
            TK = TK_CAP
            Mpad = _round_up(M3, TK)
        KT = Mpad // TK

        Jf = J.astype(jnp.float32)
        G = jax.vmap(self._build_G)(x)                  # [B, 3N, 3N] f32

        mxu_dt = jnp.bfloat16
        Lp = jnp.pad(self.L_dense,
                     ((0, Mpad - M3), (0, Mpad - M3))).astype(mxu_dt)          # (Mpad,Mpad)
        Gp = jnp.pad(G, ((0, 0), (0, Mpad - M3), (0, Mpad - M3))).astype(mxu_dt)
        Jpad_f32 = jnp.pad(Jf, ((0, 0), (0, Mpad - M3), (0, Dpad - D)))
        Jp = Jpad_f32.astype(mxu_dt)                                           # (B,Mpad,Dpad)
        JTp = jnp.swapaxes(Jpad_f32, -1, -2)                                   # (B,Dpad,Mpad) f32

        mats_pad = pl.pallas_call(
            _arap_kernel,
            out_shape=jax.ShapeDtypeStruct((Bsz, Dpad, Dpad), jnp.float32),
            grid_spec=pltpu.PrefetchScalarGridSpec(
                num_scalar_prefetch=0,
                grid=(Bsz, KT),
                in_specs=[
                    pl.BlockSpec((TK, Mpad),      lambda b, kk: (kk, 0)),   # L row-block (shared)
                    pl.BlockSpec((1, TK, Mpad),   lambda b, kk: (b, kk, 0)),  # G row-block
                    pl.BlockSpec((1, Mpad, Dpad), lambda b, kk: (b, 0, 0)),   # J (resident over k)
                    pl.BlockSpec((1, Dpad, TK),   lambda b, kk: (b, 0, kk)),  # J^T col-block
                ],
                out_specs=pl.BlockSpec((1, Dpad, Dpad), lambda b, kk: (b, 0, 0)),
                scratch_shapes=[pltpu.VMEM((Dpad, Dpad), jnp.float32)],
            ),
            compiler_params=pltpu.CompilerParams(
                dimension_semantics=("parallel", "arbitrary")),
        )(Lp, Gp, Jp, JTp)

        mats = mats_pad[:, :D, :D]

        # symmetrize before the eigendecomposition (bf16 matmuls make the two
        # terms only symmetric up to rounding).
        mats_sym = 0.5 * (mats + jnp.swapaxes(mats, -1, -2))
        # TODO(synk): symmetric eigendecomposition has no clean Pallas TPU
        # equivalent; computed with plain JAX on the kernel output.
        e = jnp.clip(jnp.linalg.eigvalsh(mats_sym), 1e-10, None)
        traces = jnp.sum(e ** self.norm, axis=-1)       # [B]
        return traces.mean(), mats


# ----------------------------- references (JAX) ---------------------------- #

def _rd_bf16(a):
    return a.astype(jnp.bfloat16).astype(jnp.float32)


def _ref_mats_matched(arap, x, J):
    """Mirrors the kernel's factored / mixed-precision path (tight check)."""
    Lr = _rd_bf16(arap.L_dense)

    def one(xb, Jb):
        G = arap._build_G(xb)
        Gr, Jr = _rd_bf16(G), _rd_bf16(Jb)
        GJ = Gr @ Jr
        return Jb.T @ (Lr @ Jr) - GJ.T @ GJ

    return jax.vmap(one)(x, J.astype(jnp.float32))


def _ref_mats_f32(arap, x, J):
    """Faithful dense f32 evaluation of the original PyTorch math (loose check)."""
    L = arap.L_dense

    def one(xb, Jb):
        Bm = arap._build_B(xb)
        Cinv = jnp.linalg.inv(arap._reg_C(arap._build_C_blocks(xb)))   # [N,3,3]
        BTJ = Bm.T @ Jb                                                # [3N,D]
        CBTJ = jnp.matmul(Cinv, BTJ.reshape(arap.N, 3, -1)).reshape(3 * arap.N, -1)
        return Jb.T @ (L @ Jb) - BTJ.T @ CBTJ

    return jax.vmap(one)(x, J.astype(jnp.float32))


# ---------------------------------- main ----------------------------------- #

if __name__ == "__main__":
    # small synthetic triangle-strip mesh: every vertex belongs to a face.
    N = 16            # num points  -> 3N = 48
    D = 16            # Jacobian latent dim
    B = 2             # batch
    template_face = np.array([[i, i + 1, i + 2] for i in range(N - 2)],
                             dtype=np.int64)

    arap = ARAP(template_face, num_points=N, norm=0.5)

    key = jax.random.PRNGKey(0)
    kx, kj = jax.random.split(key)
    x = jax.random.normal(kx, (B, N, 3), dtype=jnp.float32)
    J = jax.random.normal(kj, (B, N * 3, D), dtype=jnp.float32) * 0.1

    trace_mean, Hbars = arap.forward(x, J)
    trace_mean = jax.block_until_ready(trace_mean)
    Hbars = jax.block_until_ready(Hbars)

    assert Hbars.shape == (B, D, D)
    assert bool(jnp.isfinite(trace_mean))

    # 1) tight check against a reference mirroring the kernel's arithmetic
    ref_m = jax.block_until_ready(_ref_mats_matched(arap, x, J))
    scale = float(jnp.max(jnp.abs(ref_m))) + 1e-6
    err_m = float(jnp.max(jnp.abs(Hbars - ref_m)))
    assert err_m <= 2.5e-2 * scale, f"matched-ref mismatch: {err_m} vs scale {scale}"

    # 2) loose check against the faithful dense f32 math of the PyTorch module
    ref_f = jax.block_until_ready(_ref_mats_f32(arap, x, J))
    scale_f = float(jnp.max(jnp.abs(ref_f))) + 1e-6
    err_f = float(jnp.max(jnp.abs(Hbars - ref_f)))
    assert err_f <= 7e-2 * scale_f, f"f32-ref mismatch: {err_f} vs scale {scale_f}"

    print("KERNEL_OK")
</pallas_src>

<mosaic_0001>
module attributes {stable_mosaic.version = 11 : i64} {
  func.func @_arap_kernel(%arg0: i32, %arg1: i32, %arg2: memref<48x48xbf16, #tpu.memory_space<vmem>>, %arg3: memref<1x48x48xbf16, #tpu.memory_space<vmem>>, %arg4: memref<1x48x128xbf16, #tpu.memory_space<vmem>>, %arg5: memref<1x128x48xf32, #tpu.memory_space<vmem>>, %arg6: memref<1x128x128xf32, #tpu.memory_space<vmem>>, %arg7: memref<128x128xf32, #tpu.memory_space<vmem>>) attributes {dimension_semantics = [#tpu.dimension_semantics<parallel>, #tpu.dimension_semantics<arbitrary>], iteration_bounds = array<i64: 2, 1>, scalar_prefetch = 0 : i64, scratch_operands = 1 : i64, tpu.core_type = #tpu.core_type<tc>, window_params = [{transform_indices = @transform_0, window_bounds = array<i64: 48, 48>}, {transform_indices = @transform_1, window_bounds = array<i64: 1, 48, 48>}, {transform_indices = @transform_2, window_bounds = array<i64: 1, 48, 128>}, {transform_indices = @transform_3, window_bounds = array<i64: 1, 128, 48>}, {transform_indices = @transform_4, window_bounds = array<i64: 1, 128, 128>}]} {
    %c0_i32 = arith.constant 0 : i32
    %0 = arith.cmpi eq, %arg1, %c0_i32 : i32
    %1 = arith.extui %0 : i1 to i32
    %c0_i32_0 = arith.constant 0 : i32
    %2 = arith.cmpi ne, %1, %c0_i32_0 : i32
    scf.if %2 {
      %cst_20 = arith.constant 0.000000e+00 : f32
      %21 = vector.broadcast %cst_20 : f32 to vector<128x128xf32>
      %c0_21 = arith.constant 0 : index
      %c0_22 = arith.constant 0 : index
      %22 = vector.load %arg7[%c0_21, %c0_22] : memref<128x128xf32, #tpu.memory_space<vmem>>, vector<128x128xf32>
      tpu.vector_store %arg7[%c0_21, %c0_22], %21 {strides = array<i32>} : memref<128x128xf32, #tpu.memory_space<vmem>>, vector<128x128xf32>,
    } else {
    }
    %c0 = arith.constant 0 : index
    %c0_1 = arith.constant 0 : index
    %3 = vector.load %arg2[%c0, %c0_1] : memref<48x48xbf16, #tpu.memory_space<vmem>>, vector<48x48xbf16>
    %c0_2 = arith.constant 0 : index
    %c0_3 = arith.constant 0 : index
    %c0_4 = arith.constant 0 : index
    %4 = vector.load %arg3[%c0_2, %c0_3, %c0_4] : memref<1x48x48xbf16, #tpu.memory_space<vmem>>, vector<1x48x48xbf16>
    %5 = vector.shape_cast %4 : vector<1x48x48xbf16> to vector<48x48xbf16>
    %c0_5 = arith.constant 0 : index
    %c0_6 = arith.constant 0 : index
    %c0_7 = arith.constant 0 : index
    %6 = vector.load %arg4[%c0_5, %c0_6, %c0_7] : memref<1x48x128xbf16, #tpu.memory_space<vmem>>, vector<1x48x128xbf16>
    %7 = vector.shape_cast %6 : vector<1x48x128xbf16> to vector<48x128xbf16>
    %c0_8 = arith.constant 0 : index
    %c0_9 = arith.constant 0 : index
    %c0_10 = arith.constant 0 : index
    %8 = vector.load %arg5[%c0_8, %c0_9, %c0_10] : memref<1x128x48xf32, #tpu.memory_space<vmem>>, vector<1x128x48xf32>
    %9 = vector.shape_cast %8 : vector<1x128x48xf32> to vector<128x48xf32>
    %cst = arith.constant dense<0.000000e+00> : vector<48x128xf32>
    %10 = tpu.matmul %3, %7, %cst {dimension_numbers = #tpu.dot_dimension_numbers<[1], [0], [0], [1], [0, 0, 1, 1], [], []>} : vector<48x48xbf16>, vector<48x128xbf16>, vector<48x128xf32> -> vector<48x128xf32>
    %cst_11 = arith.constant dense<0.000000e+00> : vector<48x128xf32>
    %11 = tpu.matmul %5, %7, %cst_11 {dimension_numbers = #tpu.dot_dimension_numbers<[1], [0], [0], [1], [0, 0, 1, 1], [], []>} : vector<48x48xbf16>, vector<48x128xbf16>, vector<48x128xf32> -> vector<48x128xf32>
    %cst_12 = arith.constant dense<0.000000e+00> : vector<128x128xf32>
    %12 = tpu.matmul %9, %10, %cst_12 {dimension_numbers = #tpu.dot_dimension_numbers<[1], [0], [0], [1], [0, 0, 1, 1], [], []>} : vector<128x48xf32>, vector<48x128xf32>, vector<128x128xf32> -> vector<128x128xf32>
    %cst_13 = arith.constant dense<0.000000e+00> : vector<128x128xf32>
    %13 = tpu.matmul %11, %11, %cst_13 {dimension_numbers = #tpu.dot_dimension_numbers<[0], [0], [1], [1], [0, 1, 1, 1], [], []>} : vector<48x128xf32>, vector<48x128xf32>, vector<128x128xf32> -> vector<128x128xf32>
    %c0_14 = arith.constant 0 : index
    %c0_15 = arith.constant 0 : index
    %14 = vector.load %arg7[%c0_14, %c0_15] : memref<128x128xf32, #tpu.memory_space<vmem>>, vector<128x128xf32>
    %15 = arith.subf %12, %13 : vector<128x128xf32>
    %16 = arith.addf %14, %15 : vector<128x128xf32>
    %c0_16 = arith.constant 0 : index
    %c0_17 = arith.constant 0 : index
    %17 = vector.load %arg7[%c0_16, %c0_17] : memref<128x128xf32, #tpu.memory_space<vmem>>, vector<128x128xf32>
    tpu.vector_store %arg7[%c0_16, %c0_17], %16 {strides = array<i32>} : memref<128x128xf32, #tpu.memory_space<vmem>>, vector<128x128xf32>,
    %c0_i32_18 = arith.constant 0 : i32
    %18 = arith.cmpi eq, %arg1, %c0_i32_18 : i32
    %19 = arith.extui %18 : i1 to i32
    %c0_i32_19 = arith.constant 0 : i32
    %20 = arith.cmpi ne, %19, %c0_i32_19 : i32
    scf.if %20 {
      %c0_20 = arith.constant 0 : index
      %c0_21 = arith.constant 0 : index
      %21 = vector.load %arg7[%c0_20, %c0_21] : memref<128x128xf32, #tpu.memory_space<vmem>>, vector<128x128xf32>
      %c0_22 = arith.constant 0 : index
      %c0_23 = arith.constant 0 : index
      %c0_24 = arith.constant 0 : index
      %22 = vector.load %arg6[%c0_22, %c0_23, %c0_24] : memref<1x128x128xf32, #tpu.memory_space<vmem>>, vector<1x128x128xf32>
      %23 = vector.shape_cast %22 : vector<1x128x128xf32> to vector<128x128xf32>
      %24 = vector.shape_cast %21 : vector<128x128xf32> to vector<1x128x128xf32>
      tpu.vector_store %arg6[%c0_22, %c0_23, %c0_24], %24 {strides = array<i32>} : memref<1x128x128xf32, #tpu.memory_space<vmem>>, vector<1x128x128xf32>,
    } else {
    }
    return
  }
  func.func @transform_0(%arg0: i32, %arg1: i32) -> (i32, i32) {
    %c0_i32 = arith.constant 0 : i32
    %c0_i32_0 = arith.constant 0 : i32
    return %arg1, %c0_i32 : i32, i32
  }
  func.func @transform_1(%arg0: i32, %arg1: i32) -> (i32, i32, i32) {
    %c0_i32 = arith.constant 0 : i32
    %c0_i32_0 = arith.constant 0 : i32
    return %arg0, %arg1, %c0_i32 : i32, i32, i32
  }
  func.func @transform_2(%arg0: i32, %arg1: i32) -> (i32, i32, i32) {
    %c0_i32 = arith.constant 0 : i32
    %c0_i32_0 = arith.constant 0 : i32
    %c0_i32_1 = arith.constant 0 : i32
    return %arg0, %c0_i32, %c0_i32_0 : i32, i32, i32
  }
  func.func @transform_3(%arg0: i32, %arg1: i32) -> (i32, i32, i32) {
    %c0_i32 = arith.constant 0 : i32
    %c0_i32_0 = arith.constant 0 : i32
    return %arg0, %c0_i32, %arg1 : i32, i32, i32
  }
  func.func @transform_4(%arg0: i32, %arg1: i32) -> (i32, i32, i32) {
    %c0_i32 = arith.constant 0 : i32
    %c0_i32_0 = arith.constant 0 : i32
    %c0_i32_1 = arith.constant 0 : i32
    return %arg0, %c0_i32, %c0_i32_0 : i32, i32, i32
  }
}

</mosaic_0001>

<bundles_post_ra>
// kernel: tpu_custom_call.1
= control target key start
LH: loop header
LB: loop body
LE: loop exit
PB: predicated region body
PF: predicated region fallthrough
CT: control target
= control target key end

     0   :  { %9 = vsyncpa [#allocation4], 0  ;;  %s1435_s0 = inlined_call_operand.vmem [shape: bf16[48,48], index: 0, kind: input, shape index: {}]   ;;  %s1436_s1 = inlined_call_operand.vmem [shape: bf16[2,48,48], index: 1, kind: input, shape index: {}]   ;;  %s1437_s2 = inlined_call_operand.vmem [shape: bf16[2,48,128], index: 2, kind: input, shape index: {}]   ;;  %s1438_s3 = inlined_call_operand.vmem [shape: f32[2,128,48], index: 3, kind: input, shape index: {}]   ;;  %s1439_s4 = inlined_call_operand.hbm [shape: f32[2,128,128], index: 4, kind: output, shape index: {}]  }
   0x1   :  { %11 = vsyncpa [#allocation4 + $0x1], 0  ;;  %s1240_s15 = smov 0   ;;  %s1242_s16 = smov 0  }
   0x2   :  { %s1244_s17 = smov 0   ;;  %s1246_s18 = smov 0  }
   0x3   :  { %s1248_s19 = smov 0   ;;  %s1250_s20 = smov 0  }
   0x4 LB: > { %s961_s21 = sadd.s32 4294967295, %s1211_s20   ;;  %s962_s22 = sadd.s32 4294967294, %s1211_s20   ;;  %s1211_s20 = sphi %s1250_s20, %s17_s20   ;;  %s1207_s19 = sphi %s1248_s19, %s1446_s19   ;;  %s1203_s18 = sphi %s1246_s18, %s1445_s18   ;;  %s1199_s17 = sphi %s1244_s17, %s1444_s17   ;;  %s1195_s16 = sphi %s1242_s16, %s1443_s16   ;;  %s1191_s15 = sphi %s1240_s15, %s1442_s15  }
   0x5   : > { %s29_s23 = sadd.s32 1, %s1207_s19  ;;  %s144_s24 = sadd.s32 1, %s1199_s17 }
   0x6   : > { %p31_p0 = scmp.ge.s32.totalorder %s29_s23, 2  ;;  %p154_p1 = scmp.ne.s32.totalorder %s1199_s17, %s1195_s16 }
   0x7   : > { %p155_p2 = scmp.eq.s32.totalorder %s961_s21, 1  ;;  %p160_p3 = scmp.ne.s32.totalorder %s1195_s16, %s1191_s15 }
   0x8   : > { %s1448_s23 = smov (%p31_p0, %s29_s23), 0  ;;  %p161_p5 = scmp.eq.s32.totalorder %s962_s22, 1 }
   0x9   : > { %p1280_p4 = por %p155_p2, %p154_p1  ;;  %s141_s26 = ssub.s32 %s1207_s19, %s1448_s23 }
   0xa   : > { %p966_p6 = scmp.ge.s32.totalorder %s1211_s20, 1  ;;  %p142_p7 = scmp.eq.s32.totalorder %s141_s26, 0 }
   0xb   : > { %p1287_p8 = por %p161_p5, %p160_p3  ;;  %p220_p9 = scmp.lt.s32.totalorder %s1211_s20, 3 }
   0xc   : > { %s1293_s28 = scalar_select %p142_p7, %s1199_s17, %s144_s24  }
   0xd   : > { %p221_p10 = pnand %p966_p6, %p220_p9 }
   0xe   : > { %p275_p11 = scmp.lt.s32.totalorder (!%p221_p10), %s1203_s18, 1  ;;  %s1061_s8 = sshll.u32 (!%p221_p10), %s1203_s18, 7 }
   0xf   : > { %224 = sbr.rel (%p221_p10) target bundleno = 586 (0x24a), region = 36  ;;  %s836_s11 = scalar_lea.hbm (!%p221_p10), %s1439_s4, %s1061_s8 }
  0x10   : > { %s839_s13 = sshll.u32 (!%p221_p10), %s836_s11, 4  ;;  %s1153_s26 = scalar_lea.hbm (!%p221_p10), %s1439_s4, 256  ;;  %s840_s13 = int_to_ptr.hbm [resolvable:$true] %s839_s13 }
  0x11   : > { %s1147_s21 = sshra.s32 (!%p221_p10), %s840_s13, 4  ;;  %s1148_s21 = int_to_ptr.hbm [resolvable:$true] %s1147_s21 }
  0x12   : > { %p1154_p1 = scmp.lt.s32.totalorder (!%p221_p10), %s1148_s21, %s1439_s4 }
  0x14   : > { %s1297_s29 = scalar_select %p275_p11, %s1203_s18, 1  ;;  %vm385_vm0 = vcmask 392192   ;;  %v1052_v4 = vld [vmem:[%s1435_s0] sm:$0xff]  ;;  %v1053_v6 = vld [vmem:[%s1435_s0 + $0x8] sm:$0xff]  ;;  %v1054_v8 = vld [vmem:[%s1435_s0 + $0x10] sm:$0xff] }
  0x15   : > { %s1149_s18 = scalar_lea.hbm %s1148_s21, 128 }
  0x16   : > { %s1074_s30 = smul.u32 24, %s1297_s29  ;;  %s1051_s24 = sshll.u32 %s1297_s29, 7 }
  0x17   : > { %s1325_s5 = scalar_lea.vmem %s1438_s3, %s1051_s24  ;;  %s265_s29 = sand.u32 1, %s1195_s16  }
  0x18   : > { %s288_s7 = scalar_lea.vmem %s1437_s2, %s1074_s30  ;;  %s282_s10 = scalar_lea.vmem %s1436_s1, %s1074_s30  ;;  %v336_v21 = vld [vmem:[%s1325_s5] sm:$0xff]  ;;  %v337_v22 = vld [vmem:[%s1325_s5 + $0x8] sm:$0xff]  ;;  %v338_v23 = vld [vmem:[%s1325_s5 + $0x10] sm:$0xff] }
  0x19   : > { %v1060_v0 = vld [vmem:[%s288_s7 + $0x10] sm:$0xff]  ;;  %v1059_v1 = vld [vmem:[%s288_s7 + $0x8] sm:$0xff]  ;;  %v1058_v2 = vld [vmem:[%s288_s7] sm:$0xff]  ;;  %s967_s6 = sshll.u32 %s265_s29, 7  ;;  %s825_s14 = scalar_lea.sflag [#allocation4], %s265_s29 }
  0x1a   : > { %448 = vmatpush.bf16.msra.mxu1 %v1060_v0  ;;  %400 = vmatpush.bf16.msra.mxu0 %v1060_v0  ;;  %v1055_v3 = vld [vmem:[%s282_s10] sm:$0xff]  ;;  %v1056_v5 = vld [vmem:[%s282_s10 + $0x8] sm:$0xff]  ;;  %v1057_v7 = vld [vmem:[%s282_s10 + $0x10] sm:$0xff]  ;;  %s1378_s7 = scalar_lea.vmem [#allocation3], %s967_s6  ;;  %p1150_p12 = scmp.ne.s32.totalorder %s1148_s21, %s1149_s18 }
  0x1b   : > { %v339_v24 = vld [vmem:[%s1325_s5 + $0x18] sm:$0xff]  ;;  %v340_v26 = vld [vmem:[%s1325_s5 + $0x20] sm:$0xff]  ;;  %v341_v28 = vld [vmem:[%s1325_s5 + $0x28] sm:$0xff]  ;;  %s837_s12 = sshll.u32 %s1378_s7, 4  ;;  %p1155_p2 = scmp.lt.s32.totalorder %s1153_s26, %s1149_s18  ;;  %s838_s12 = int_to_ptr.vmem [resolvable:$true] %s837_s12 }
  0x1c   : > { %v342_v30 = vld [vmem:[%s1325_s5 + $0x30] sm:$0xff]  ;;  %v343_v32 = vld [vmem:[%s1325_s5 + $0x38] sm:$0xff]  ;;  %v344_v34 = vld [vmem:[%s1325_s5 + $0x40] sm:$0xff]  ;;  %p1151_p13 = pnand %p1150_p12, %p1280_p4 }
  0x1d   : > { %v345_v36 = vld [vmem:[%s1325_s5 + $0x48] sm:$0xff]  ;;  %v346_v38 = vld [vmem:[%s1325_s5 + $0x50] sm:$0xff]  ;;  %v347_v40 = vld [vmem:[%s1325_s5 + $0x58] sm:$0xff]  ;;  %p1156_p3 = por %p1155_p2, %p1154_p1 }
  0x1e   : > { %449 = vmatpush.bf16.msra.mxu1 %v1059_v1  ;;  %401 = vmatpush.bf16.msra.mxu0 %v1059_v1  ;;  %v348_v42 = vld [vmem:[%s1325_s5 + $0x60] sm:$0xff]  ;;  %v349_v44 = vld [vmem:[%s1325_s5 + $0x68] sm:$0xff]  ;;  %v350_v46 = vld [vmem:[%s1325_s5 + $0x70] sm:$0xff]  ;;  %p1152_p0 = pneg %p1151_p13 }
  0x1f   : > { %v351_v48 = vld [vmem:[%s1325_s5 + $0x78] sm:$0xff] }
  0x20   : > { %p1157_p5 = pnand %p1156_p3, %p1152_p0 }
  0x22   : > { %450 = vmatpush.bf16.msra.mxu1 %v1058_v2  ;;  %402 = vmatpush.bf16.msra.mxu0 %v1058_v2 }
  0x25   : > { %1011 = vmatmul.msk.bf16.vlgmr.msra.gmra.mxu1 %vm385_vm0, %v1055_v3  ;;  %996 = vmatmul.msk.bf16.vlgmr.msra.gmra.mxu0 %vm385_vm0, %v1052_v4 }
  0x35   : > { %1012 = vmatmul.msk.bf16.gmra.mxu1 %vm385_vm0, %v1056_v5  ;;  %997 = vmatmul.msk.bf16.gmra.mxu0 %vm385_vm0, %v1053_v6 }
  0x45   : > { %1013 = vmatmul.msk.bf16.gmra.mxu1 %vm385_vm0, %v1057_v7  ;;  %998 = vmatmul.msk.bf16.gmra.mxu0 %vm385_vm0, %v1054_v8 }
  0xa2   : > { %v452_v9 = vpop.f32.mrf.mxu1  ;;  %v404_v15 = vpop.f32.mrf.mxu0 }
  0xa3   : > { %580 = vxpose.xlu0.b32.start [1/6] (short) %v452_v9, 128 }
  0xaa   : > { %v454_v10 = vpop.f32.mrf.mxu1  ;;  %v406_v16 = vpop.f32.mrf.mxu0 }
  0xab   : > { %581 = vxpose.xlu0.b32.cont [2/6] (short) %v454_v10, 128 }
  0xb2   : > { %v457_v11 = vpop.f32.mrf.mxu1  ;;  %v409_v17 = vpop.f32.mrf.mxu0 }
  0xb3   : > { %582 = vxpose.xlu0.b32.cont [3/6] (short) %v457_v11, 128 }
  0xba   : > { %v459_v12 = vpop.f32.mrf.mxu1  ;;  %v411_v18 = vpop.f32.mrf.mxu0 }
  0xbb   : > { %583 = vxpose.xlu0.b32.cont [4/6] (short) %v459_v12, 128 }
  0xc2   : > { %v462_v13 = vpop.f32.mrf.mxu1  ;;  %v414_v19 = vpop.f32.mrf.mxu0 }
  0xc3   : > { %584 = vxpose.xlu0.b32.cont [5/6] (short) %v462_v13, 128 }
  0xca   : > { %v464_v14 = vpop.f32.mrf.mxu1  ;;  %v416_v20 = vpop.f32.mrf.mxu0 }
  0xcb   : > { %585 = vxpose.xlu0.b32.end [6/6] (short) %v464_v14, 128  ;;  %670 = vmatpush.msrb.mxu1 %v464_v14 }
  0xcc   : > { %1068 = vmatpush.msra.mxu3 %v464_v14  ;;  %525 = vmatpush.msrb.mxu0 %v416_v20 }
  0xcd   : > { %671 = vmatpush.msrb.mxu1 %v462_v13  ;;  %1062 = vmatpush.msra.mxu2 %v416_v20 }
  0xce   : > { %1069 = vmatpush.msra.mxu3 %v462_v13  ;;  %526 = vmatpush.msrb.mxu0 %v414_v19 }
  0xcf   : > { %672 = vmatpush.msrb.mxu1 %v459_v12  ;;  %1063 = vmatpush.msra.mxu2 %v414_v19 }
  0xd0   : > { %1070 = vmatpush.msra.mxu3 %v459_v12  ;;  %527 = vmatpush.msrb.mxu0 %v411_v18 }
  0xd1   : > { %673 = vmatpush.msrb.mxu1 %v457_v11  ;;  %1064 = vmatpush.msra.mxu2 %v411_v18 }
  0xd2   : > { %1071 = vmatpush.msra.mxu3 %v457_v11  ;;  %528 = vmatpush.msrb.mxu0 %v409_v17 }
  0xd3   : > { %674 = vmatpush.msrb.mxu1 %v454_v10  ;;  %1065 = vmatpush.msra.mxu2 %v409_v17 }
  0xd4   : > { %1072 = vmatpush.msra.mxu3 %v454_v10  ;;  %529 = vmatpush.msrb.mxu0 %v406_v16 }
  0xd5   : > { %675 = vmatpush.msrb.mxu1 %v452_v9  ;;  %1066 = vmatpush.msra.mxu2 %v406_v16 }
  0xd6   : > { %1073 = vmatpush.msra.mxu3 %v452_v9  ;;  %530 = vmatpush.msrb.mxu0 %v404_v15 }
  0xd7   : > { %1067 = vmatpush.msra.mxu2 %v404_v15  ;;  %1014 = vmatmul.msk.f32.vlgmr.msrb.gmra.mxu0 %vm385_vm0, %v336_v21 }
  0xd8   : > { %1019 = vmatmul.msk.f32.vlgmr.msra.gmra.mxu2 %vm385_vm0, %v341_v28 }
  0xdf   : > { %1015 = vmatmul.msk.f32.gmra.mxu0 %vm385_vm0, %v337_v22 }
  0xe0   : > { %1020 = vmatmul.msk.f32.gmra.mxu2 %vm385_vm0, %v342_v30 }
  0xe7   : > { %1016 = vmatmul.msk.f32.gmra.mxu0 %vm385_vm0, %v338_v23 }
  0xe8   : > { %1021 = vmatmul.msk.f32.gmra.mxu2 %vm385_vm0, %v343_v32 }
  0xef   : > { %1017 = vmatmul.msk.f32.gmra.mxu0 %vm385_vm0, %v339_v24 }
  0xf0   : > { %1022 = vmatmul.msk.f32.gmra.mxu2 %vm385_vm0, %v344_v34 }
  0xf7   : > { %1018 = vmatmul.msk.f32.gmra.mxu0 %vm385_vm0, %v340_v26 }
  0xf8   : > { %1023 = vmatmul.msk.f32.gmra.mxu2 %vm385_vm0, %v345_v36 }
 0x100   : > { %1024 = vmatmul.msk.f32.gmra.mxu2 %vm385_vm0, %v346_v38 }
 0x108   : > { %1025 = vmatmul.msk.f32.gmra.mxu2 %vm385_vm0, %v347_v40 }
 0x110   : > { %1026 = vmatmul.msk.f32.gmra.mxu2 %vm385_vm0, %v348_v42 }
 0x118   : > { %1027 = vmatmul.msk.f32.gmra.mxu2 %vm385_vm0, %v349_v44 }
 0x120   : > { %1028 = vmatmul.msk.f32.gmra.mxu2 %vm385_vm0, %v350_v46 }
 0x128   : > { %1029 = vmatmul.msk.f32.gmra.mxu2 %vm385_vm0, %v351_v48 }
 0x147   : > { %v596_v25 = vpop.trf.xlu0 }
 0x148   : > { %1030 = vmatmul.msk.f32.vlgmr.msrb.gmra.mxu1 %vm385_vm0, %v596_v25 }
 0x14f   : > { %v597_v27 = vpop.trf.xlu0 }
 0x150   : > { %1031 = vmatmul.msk.f32.gmra.mxu1 %vm385_vm0, %v597_v27 }
 0x154   : > { %v532_v52 = vpop.f32.mrf.mxu0 }
 0x157   : > { %v598_v29 = vpop.trf.xlu0 }
 0x158   : > { %1032 = vmatmul.msk.f32.gmra.mxu1 %vm385_vm0, %v598_v29 }
 0x15b   : > { %v547_v0 = vpop.f32.mrf.mxu2 }
 0x15c   : > { %v535_v55 = vpop.f32.mrf.mxu0 }
 0x15f   : > { %v599_v31 = vpop.trf.xlu0 }
 0x160   : > { %1033 = vmatmul.msk.f32.gmra.mxu1 %vm385_vm0, %v599_v31 }
 0x163   : > { %v550_v5 = vpop.f32.mrf.mxu2 }
 0x164   : > { %v538_v59 = vpop.f32.mrf.mxu0 }
 0x167   : > { %v600_v33 = vpop.trf.xlu0 }
 0x168   : > { %1034 = vmatmul.msk.f32.gmra.mxu1 %vm385_vm0, %v600_v33 }
 0x16b   : > { %v553_v6 = vpop.f32.mrf.mxu2 }
 0x16c   : > { %v541_v62 = vpop.f32.mrf.mxu0 }
 0x16f   : > { %v601_v35 = vpop.trf.xlu0 }
 0x170   : > { %1035 = vmatmul.msk.f32.vlgmr.msra.gmra.mxu3 %vm385_vm0, %v601_v35 }
 0x173   : > { %v556_v10 = vpop.f32.mrf.mxu2 }
 0x174   : > { %v544_v2 = vpop.f32.mrf.mxu0 }
 0x177   : > { %v602_v37 = vpop.trf.xlu0 }
 0x178   : > { %1036 = vmatmul.msk.f32.gmra.mxu3 %vm385_vm0, %v602_v37 }
 0x17b   : > { %v559_v14 = vpop.f32.mrf.mxu2 }
 0x17f   : > { %v603_v39 = vpop.trf.xlu0 }
 0x180   : > { %1037 = vmatmul.msk.f32.gmra.mxu3 %vm385_vm0, %v603_v39 }
 0x183   : > { %v562_v17 = vpop.f32.mrf.mxu2 }
 0x187   : > { %v604_v41 = vpop.trf.xlu0 }
 0x188   : > { %1038 = vmatmul.msk.f32.gmra.mxu3 %vm385_vm0, %v604_v41 }
 0x18b   : > { %v565_v20 = vpop.f32.mrf.mxu2 }
 0x18f   : > { %v605_v43 = vpop.trf.xlu0 }
 0x190   : > { %1039 = vmatmul.msk.f32.gmra.mxu3 %vm385_vm0, %v605_v43 }
 0x193   : > { %v568_v24 = vpop.f32.mrf.mxu2 }
 0x197   : > { %v606_v45 = vpop.trf.xlu0 }
 0x198   : > { %1040 = vmatmul.msk.f32.gmra.mxu3 %vm385_vm0, %v606_v45 }
 0x19b   : > { %v571_v28 = vpop.f32.mrf.mxu2 }
 0x19f   : > { %v607_v47 = vpop.trf.xlu0 }
 0x1a0   : > { %1041 = vmatmul.msk.f32.gmra.mxu3 %vm385_vm0, %v607_v47 }
 0x1a3   : > { %v574_v31 = vpop.f32.mrf.mxu2 }
 0x1a7   : > { %v608_v49 = vpop.trf.xlu0 }
 0x1a8   : > { %1042 = vmatmul.msk.f32.gmra.mxu3 %vm385_vm0, %v608_v49 }
 0x1ab   : > { %v577_v34 = vpop.f32.mrf.mxu2 }
 0x1af   : > { %v609_v50 = vpop.trf.xlu0 }
 0x1b0   : > { %1043 = vmatmul.msk.f32.gmra.mxu3 %vm385_vm0, %v609_v50 }
 0x1b7   : > { %v610_v51 = vpop.trf.xlu0 }
 0x1b8   : > { %1044 = vmatmul.msk.f32.gmra.mxu3 %vm385_vm0, %v610_v51 }
 0x1bf   : > { %v611_v53 = vpop.trf.xlu0 }
 0x1c0   : > { %1045 = vmatmul.msk.f32.gmra.mxu3 %vm385_vm0, %v611_v53 }
 0x1c5   : > { %v677_v54 = vpop.f32.mrf.mxu1 }
 0x1c6   : > { %v741_v56 = vsub.f32 %v532_v52, %v677_v54 }
 0x1c8   : > { %808 = vst [vmem:[%s1378_s7] sm:$0xff] %v741_v56 }
 0x1cd   : > { %v680_v57 = vpop.f32.mrf.mxu1 }
 0x1ce   : > { %v742_v58 = vsub.f32 %v535_v55, %v680_v57 }
 0x1d0   : > { %809 = vst [vmem:[%s1378_s7 + $0x8] sm:$0xff] %v742_v58 }
 0x1d5   : > { %v683_v60 = vpop.f32.mrf.mxu1 }
 0x1d6   : > { %v743_v61 = vsub.f32 %v538_v59, %v683_v60 }
 0x1d8   : > { %810 = vst [vmem:[%s1378_s7 + $0x10] sm:$0xff] %v743_v61 }
 0x1dd   : > { %v686_v63 = vpop.f32.mrf.mxu1 }
 0x1de   : > { %v744_v1 = vsub.f32 %v541_v62, %v686_v63 }
 0x1e0   : > { %811 = vst [vmem:[%s1378_s7 + $0x18] sm:$0xff] %v744_v1 }
 0x1e5   : > { %v689_v3 = vpop.f32.mrf.mxu1 }
 0x1e6   : > { %v745_v4 = vsub.f32 %v544_v2, %v689_v3 }
 0x1e8   : > { %812 = vst [vmem:[%s1378_s7 + $0x20] sm:$0xff] %v745_v4 }
 0x1f3   : > { %v692_v7 = vpop.f32.mrf.mxu3 }
 0x1f4   : > { %v746_v8 = vsub.f32 %v547_v0, %v692_v7 }
 0x1f6   : > { %813 = vst [vmem:[%s1378_s7 + $0x28] sm:$0xff] %v746_v8 }
 0x1fb   : > { %v695_v9 = vpop.f32.mrf.mxu3 }
 0x1fc   : > { %v747_v11 = vsub.f32 %v550_v5, %v695_v9 }
 0x1fe   : > { %814 = vst [vmem:[%s1378_s7 + $0x30] sm:$0xff] %v747_v11 }
 0x203   : > { %v698_v12 = vpop.f32.mrf.mxu3 }
 0x204   : > { %v748_v13 = vsub.f32 %v553_v6, %v698_v12 }
 0x206   : > { %815 = vst [vmem:[%s1378_s7 + $0x38] sm:$0xff] %v748_v13 }
 0x20b   : > { %v701_v15 = vpop.f32.mrf.mxu3 }
 0x20c   : > { %v749_v16 = vsub.f32 %v556_v10, %v701_v15 }
 0x20e   : > { %816 = vst [vmem:[%s1378_s7 + $0x40] sm:$0xff] %v749_v16 }
 0x213   : > { %v704_v18 = vpop.f32.mrf.mxu3 }
 0x214   : > { %v750_v19 = vsub.f32 %v559_v14, %v704_v18 }
 0x216   : > { %817 = vst [vmem:[%s1378_s7 + $0x48] sm:$0xff] %v750_v19 }
 0x21b   : > { %v707_v21 = vpop.f32.mrf.mxu3 }
 0x21c   : > { %v751_v22 = vsub.f32 %v562_v17, %v707_v21 }
 0x21e   : > { %818 = vst [vmem:[%s1378_s7 + $0x50] sm:$0xff] %v751_v22 }
 0x223   : > { %v710_v23 = vpop.f32.mrf.mxu3 }
 0x224   : > { %v752_v25 = vsub.f32 %v565_v20, %v710_v23 }
 0x226   : > { %819 = vst [vmem:[%s1378_s7 + $0x58] sm:$0xff] %v752_v25 }
 0x22b   : > { %v713_v26 = vpop.f32.mrf.mxu3 }
 0x22c   : > { %v753_v27 = vsub.f32 %v568_v24, %v713_v26 }
 0x22e   : > { %820 = vst [vmem:[%s1378_s7 + $0x60] sm:$0xff] %v753_v27 }
 0x233   : > { %v716_v29 = vpop.f32.mrf.mxu3 }
 0x234   : > { %v754_v30 = vsub.f32 %v571_v28, %v716_v29 }
 0x236   : > { %821 = vst [vmem:[%s1378_s7 + $0x68] sm:$0xff] %v754_v30 }
 0x23b   : > { %v719_v32 = vpop.f32.mrf.mxu3 }
 0x23c   : > { %v755_v33 = vsub.f32 %v574_v31, %v719_v32 }
 0x23e   : > { %822 = vst [vmem:[%s1378_s7 + $0x70] sm:$0xff] %v755_v33 }
 0x243   : > { %v722_v35 = vpop.f32.mrf.mxu3 }
 0x244   : > { %v756_v36 = vsub.f32 %v577_v34, %v722_v35 }
 0x246   : > { %823 = vst [vmem:[%s1378_s7 + $0x78] sm:$0xff] %v756_v36 }
 0x247   : > { %1160 = shalt.err (!%p1157_p5)
}
 0x248   : > { %s1213_s29 = smov 128   ;;  %s1214_s6 = smov 8  }
 0x249   : > { %1075 = dma.vmem_to_hbm [thread:$0]  (%p1280_p4), %s838_s12, 2048, %s840_s13, %s825_s14, %s1213_s29, %s1213_s29, %s1214_s6  }
 0x24a PF: > { %p1081_p6 = scmp.ge.s32.totalorder %s1211_s20, 2  ;;  %s854_s7 = sand.u32 1, %s1191_s15  }
 0x24b   : > { %s855_s8 = scalar_lea.sflag [#allocation4], %s854_s7 }
 0x24c   : > { %p1078_p7 = pnand %p1081_p6, %p1287_p8 }
 0x24e   : > { %p1079_p9 = pneg %p1078_p7 }
 0x250   : > { %1186 = dma.done.wait (%p1079_p9), %s855_s8, 2048  }
 0x251   : > { %1188 = vsyncadd (%p1079_p9), %s855_s8, 4294965248  ;;  %s17_s20 = sadd.s32 1, %s1211_s20   ;;  %s1442_s15 = smov %s1195_s16 }
 0x252   : > { %p14_p10 = scmp.ge.s32.totalorder %s17_s20, 4   ;;  %s1443_s16 = smov %s1199_s17 }
 0x253   : > { %s1444_s17 = smov %s1293_s28  ;;  %s1445_s18 = smov %s1207_s19 }
 0x254   : > { %s1446_s19 = smov %s1448_s23  ;;  %16 = sbr.rel (!%p14_p10) target bundleno = 4 (0x4), region = 88 }
 0x259   :  { %861 = vsyncpa [#allocation4], 1 }
 0x25a   :  { %863 = vsyncpa [#allocation4 + $0x1], 1 }

</bundles_post_ra>
